<compile_context>
chip_gen: v5e
topology: v5e:2x2
jax: 0.10.0
libtpu: 0.0.40
codegen_flags: <defaults>
</compile_context>

<pallas_src>
import jax
import jax.numpy as jnp
from jax.experimental import pallas as pl
from jax.experimental.pallas import tpu as pltpu

_LANE = 128


def _im2seq_kernel(x_ref, o_ref):
    # x_ref block: (TB, TC, W) ; o_ref block: (TB, W, TC)
    o_ref[...] = jnp.transpose(x_ref[...], (0, 2, 1))


def _round_up(x, m):
    return ((x + m - 1) // m) * m


def _sublane_multiple(itemsize):
    # Packed sublane multiple: 8 for 4-byte, 16 for 2-byte, 32 for 1-byte dtypes.
    return max(8, 32 // max(1, itemsize))


def _padded_block_bytes(tb, tc, w, itemsize):
    """VMEM bytes of one input + one output block, including lane/sublane padding."""
    sub = _sublane_multiple(itemsize)
    in_b = tb * _round_up(tc, sub) * _round_up(w, _LANE) * itemsize
    out_b = tb * _round_up(w, sub) * _round_up(tc, _LANE) * itemsize
    return in_b, out_b


def _vmem_capacity_bytes():
    """Per-core VMEM capacity; conservative fallback = v7x's 64 MiB per TC."""
    try:
        info = pltpu.get_tpu_info()
        for name in ("vmem_capacity_bytes", "vmem_bytes", "vmem_size_bytes"):
            v = getattr(info, name, None)
            if v:
                return int(v)
    except Exception:
        pass
    return 64 << 20


def _is_megacore():
    """True for parts with 2 TensorCores per device (v4 / v7x)."""
    try:
        kind = jax.devices()[0].device_kind.lower()
    except Exception:
        return False
    return any(tag in kind for tag in ("v4", "v7", "7x"))


def _choose_channel_tile(C):
    """Channel tile so the output block's last dim is a 128-multiple when possible."""
    if C % _LANE == 0:
        for tc in (512, 256, 128):
            if C > tc and C % tc == 0:
                return tc
        return C  # C == 128
    # TODO(synk): if C is not a multiple of 128, output stores are lane-masked
    # (vst.msk); pad C at the call site if the consumer tolerates it.
    return C


def _choose_batch_tile(B, tc, W, itemsize, buf_budget, n_c_steps, megacore):
    """Batch rows per grid step, sized from the padded VMEM footprint."""
    in1, out1 = _padded_block_bytes(1, tc, W, itemsize)
    # ~4 MiB input tiles amortize the ~0.35 us per-step cost toward the HBM roofline.
    tb = max(1, (4 << 20) // max(1, in1))
    # Keep the double-buffered footprint (2 input + 2 output buffers) under budget.
    tb = min(tb, max(1, buf_budget // (2 * (in1 + out1))))
    if megacore:
        # Keep >= ~8 total grid steps (when B allows) so both TensorCores get work;
        # channel steps already contribute, so only demand the remainder from batch.
        min_b_steps = pl.cdiv(8, max(1, n_c_steps))
        tb = min(tb, max(1, pl.cdiv(B, min_b_steps)))
    return min(tb, B)


def im2seq(x, *, batch_tile=None):
    """x: (B, C, 1, W) NCHW with H == 1. Returns (B, W, C)."""
    B, C, H, W = x.shape
    assert H == 1, "Im2Seq requires H == 1 (squeeze dim=2)"
    x3 = x.reshape(B, C, W)  # glue: drop the H=1 dim (metadata only, no data movement)

    itemsize = jnp.dtype(x.dtype).itemsize
    vmem_cap = _vmem_capacity_bytes()
    # ~5/8 of VMEM for the pipelined buffers (~40 MiB on v7x, capped on 128 MiB parts).
    buf_budget = min((vmem_cap * 5) // 8, 80 << 20)

    tc = _choose_channel_tile(C)
    n_c_steps = pl.cdiv(C, tc)
    if batch_tile is None:
        tb = _choose_batch_tile(B, tc, W, itemsize, buf_budget, n_c_steps, _is_megacore())
    else:
        tb = min(int(batch_tile), B)
    n_b_steps = pl.cdiv(B, tb)  # ragged tail block allowed; no 1-row fallback

    in_b, out_b = _padded_block_bytes(tb, tc, W, itemsize)
    footprint = 2 * (in_b + out_b)  # double-buffered input + output
    vmem_limit = int(max(32 << 20, min(footprint + (8 << 20), vmem_cap - (8 << 20))))

    # TODO(synk): if the (B, W, C) result only feeds a linear/RNN input projection,
    # prefer fusing the permute into that matmul (contract over C on the (B, C, W)
    # layout) instead of materializing this pure data-movement pass -- it removes a
    # full HBM read+write and any XLU-bound transpose cost (most relevant on v7x).
    return pl.pallas_call(
        _im2seq_kernel,
        out_shape=jax.ShapeDtypeStruct((B, W, C), x.dtype),
        grid_spec=pltpu.PrefetchScalarGridSpec(
            num_scalar_prefetch=0,
            grid=(n_b_steps, n_c_steps),
            # Input block (tb, tc, W): last dim = full W; 2nd-last = full C or a
            # 128-multiple -> satisfies the (8,128) block constraint.
            in_specs=[pl.BlockSpec((tb, tc, W), lambda b, c: (b, c, 0))],
            # Output block (tb, W, tc): last dim lane-dense whenever C % 128 == 0.
            out_specs=pl.BlockSpec((tb, W, tc), lambda b, c: (b, 0, c)),
        ),
        compiler_params=pltpu.CompilerParams(
            dimension_semantics=("parallel", "parallel"),  # megacore sharding on 2-TC parts
            vmem_limit_bytes=vmem_limit,
        ),
        cost_estimate=pl.CostEstimate(
            flops=0,
            transcendentals=0,
            bytes_accessed=2 * B * C * W * itemsize,  # pure read + write pass
        ),
    )(x3)


if __name__ == "__main__":
    key = jax.random.PRNGKey(0)

    # Small shape consistent with the module (H must be 1 for squeeze(dim=2)).
    B, C, H, W = 2, 4, 1, 16
    x = jax.random.normal(key, (B, C, H, W), dtype=jnp.float32)
    out = jax.block_until_ready(im2seq(x))
    ref = jnp.transpose(x.reshape(B, C, W), (0, 2, 1))
    assert out.shape == (B, W, C), out.shape
    assert jnp.allclose(out, ref), "mismatch vs reference (small case)"

    # Channel-tiled case (C multiple of 128 -> lane-dense output stores, 2 channel
    # steps) plus a ragged batch tail (batch_tile=2 over B=5 -> 3 batch steps with
    # a partial final block) to exercise the cdiv-based grid.
    B2, C2, W2 = 5, 256, 40
    x2 = jax.random.normal(jax.random.PRNGKey(1), (B2, C2, 1, W2), dtype=jnp.float32)
    out2 = jax.block_until_ready(im2seq(x2, batch_tile=2))
    ref2 = jnp.transpose(x2.reshape(B2, C2, W2), (0, 2, 1))
    assert out2.shape == (B2, W2, C2), out2.shape
    assert jnp.allclose(out2, ref2), "mismatch vs reference (channel-tiled / ragged case)"

    print("KERNEL_OK")
</pallas_src>

<mosaic_0001>
module attributes {stable_mosaic.version = 11 : i64} {
  func.func @_im2seq_kernel(%arg0: i32, %arg1: i32, %arg2: memref<2x4x16xf32, #tpu.memory_space<vmem>>, %arg3: memref<2x16x4xf32, #tpu.memory_space<vmem>>) attributes {dimension_semantics = [#tpu.dimension_semantics<parallel>, #tpu.dimension_semantics<parallel>], iteration_bounds = array<i64: 1, 1>, scalar_prefetch = 0 : i64, scratch_operands = 0 : i64, tpu.core_type = #tpu.core_type<tc>, window_params = [{transform_indices = @transform_0, window_bounds = array<i64: 2, 4, 16>}, {transform_indices = @transform_1, window_bounds = array<i64: 2, 16, 4>}]} {
    %c0 = arith.constant 0 : index
    %c0_0 = arith.constant 0 : index
    %c0_1 = arith.constant 0 : index
    %0 = vector.load %arg2[%c0, %c0_0, %c0_1] : memref<2x4x16xf32, #tpu.memory_space<vmem>>, vector<2x4x16xf32>
    %1 = tpu.transpose %0, [0, 2, 1] : vector<2x4x16xf32> -> vector<2x16x4xf32>
    %c0_2 = arith.constant 0 : index
    %c0_3 = arith.constant 0 : index
    %c0_4 = arith.constant 0 : index
    %2 = vector.load %arg3[%c0_2, %c0_3, %c0_4] : memref<2x16x4xf32, #tpu.memory_space<vmem>>, vector<2x16x4xf32>
    tpu.vector_store %arg3[%c0_2, %c0_3, %c0_4], %1 {strides = array<i32>} : memref<2x16x4xf32, #tpu.memory_space<vmem>>, vector<2x16x4xf32>,
    return
  }
  func.func @transform_0(%arg0: i32, %arg1: i32) -> (i32, i32, i32) {
    %c0_i32 = arith.constant 0 : i32
    %c0_i32_0 = arith.constant 0 : i32
    return %arg0, %arg1, %c0_i32 : i32, i32, i32
  }
  func.func @transform_1(%arg0: i32, %arg1: i32) -> (i32, i32, i32) {
    %c0_i32 = arith.constant 0 : i32
    %c0_i32_0 = arith.constant 0 : i32
    return %arg0, %c0_i32, %arg1 : i32, i32, i32
  }
}

</mosaic_0001>

<bundles_post_ra>
// kernel: tpu_custom_call.1
= control target key start
LH: loop header
LB: loop body
LE: loop exit
PB: predicated region body
PF: predicated region fallthrough
CT: control target
= control target key end

     0   :  { %6 = vsyncpa [#allocation3], 0  ;;  %s130_s9 = smov [#allocation2]   ;;  %s131_s11 = smov 64   ;;  %s158_s0 = inlined_call_operand.hbm [shape: f32[2,4,16], index: 0, kind: input, shape index: {}]   ;;  %s159_s1 = inlined_call_operand.vmem [shape: f32[2,16,4], index: 1, kind: output, shape index: {}]  }
   0x1   :  { %s11_s8 = sshll.u32 %s158_s0, 4  ;;  %s13_s10 = sshll.u32 %s130_s9, 4  ;;  %s12_s8 = int_to_ptr.hbm [resolvable:$true] %s11_s8  ;;  %s14_s10 = int_to_ptr.vmem [resolvable:$true] %s13_s10 }
   0x2   :  { %s132_s12 = smov 4  }
   0x3   :  { %19 = dma.hbm_to_vmem [thread:$0]  %s12_s8, 128, %s14_s10, [#allocation3], %s131_s11, %s131_s11, %s132_s12  }
   0x4   :  { %128 = dma.done.wait [#allocation3], 128  }
   0x5   :  { %129 = vsyncadd [#allocation3], 4294967168  ;;  %v24_v0 = vld [vmem:[#allocation2] sm:$0xf]  ;;  %v25_v1 = vld [vmem:[#allocation2 + $0x4] sm:$0xf] }
   0x6   :  { %26 = vxpose.xlu0.b32.start.end [1/1] (short) (narrow) %v24_v0, 16  ;;  %vm90_vm0 = vcmask 31744  }
  0x16   :  { %58 = vxpose.xlu0.b32.start.end [1/1] (short) (narrow) %v25_v1, 16 }
  0xaa   :  { %v42_v2 = vpop.trf.xlu0 }
  0xab   :  { %91 = vst.msk [vmem:[%s159_s1] sm:$0xff] %vm90_vm0, %v42_v2 }
  0xb2   :  { %v43_v3 = vpop.trf.xlu0 }
  0xb3   :  { %92 = vst.msk [vmem:[%s159_s1 + $0x8] sm:$0xff] %vm90_vm0, %v43_v3 }
  0xba   :  { %v74_v4 = vpop.trf.xlu0 }
  0xbb   :  { %93 = vst.msk [vmem:[%s159_s1 + $0x10] sm:$0xff] %vm90_vm0, %v74_v4 }
  0xc2   :  { %v75_v5 = vpop.trf.xlu0 }
  0xc3   :  { %94 = vst.msk [vmem:[%s159_s1 + $0x18] sm:$0xff] %vm90_vm0, %v75_v5 }
  0xc4   :  { %99 = vsyncpa [#allocation3], 1 }

</bundles_post_ra>
